<compile_context>
chip_gen: v7x
topology: tpu7x:2x2x1
jax: 0.10.0
libtpu: 0.0.40
codegen_flags: <defaults>
</compile_context>

<pallas_src>
import jax
import jax.numpy as jnp
from jax.experimental import pallas as pl
from jax.experimental.pallas import tpu as pltpu

NEG_SLOPE = 0.01  # torch.nn.LeakyReLU default negative_slope


def _leaky_relu(x):
    return jnp.where(x > 0, x, NEG_SLOPE * x)


def mlp_kernel(x_ref, w1_ref, b1_ref, w2_ref, b2_ref, w3_ref, b3_ref, o_ref):
    # Transposed layout: batch on the lane (last) axis.
    x = x_ref[...]                                       # (1, TB)

    # Layer 1 (contraction dim K=1): pure VPU broadcast multiply-add.
    # (20,1) * (1,TB) + (20,1) -> (20,TB)
    h = w1_ref[...] * x + b1_ref[...]
    h = _leaky_relu(h)

    # Layer 2: 20x20 matmul on the MXU, f32 accumulation, lane-dense result.
    # (20,20) @ (20,TB) + (20,1) -> (20,TB)
    h = jnp.dot(w2_ref[...], h, preferred_element_type=jnp.float32) + b2_ref[...]
    h = _leaky_relu(h)

    # Layer 3: (1,20) @ (20,TB) + (1,1) -> (1,TB); lane-dense output.
    h = jnp.dot(w3_ref[...], h, preferred_element_type=jnp.float32) + b3_ref[...]

    # Final ReLU; single wide unmasked store.
    o_ref[...] = jnp.maximum(h, 0.0).astype(o_ref.dtype)


def mlp_forward(x, params, *, tb=512):
    """x: (B, 1) float32. params in torch Linear layout:
       w1 (20,1), b1 (20,1), w2 (20,20), b2 (20,1), w3 (1,20), b3 (1,1)."""
    B = x.shape[0]

    # Pick a lane-dense batch tile (multiple of 128) and pad B up to it.
    if B <= tb:
        TB = 128 * pl.cdiv(max(B, 1), 128)
    else:
        TB = tb
    B_pad = TB * pl.cdiv(B, TB)

    # Transpose batch onto the lane axis, zero-pad the tail.
    xt = jnp.zeros((1, B_pad), jnp.float32).at[0, :B].set(x[:, 0].astype(jnp.float32))

    resident = lambda i: (0, 0)  # weights/biases: same block every step -> stay in VMEM

    out_t = pl.pallas_call(
        mlp_kernel,
        out_shape=jax.ShapeDtypeStruct((1, B_pad), jnp.float32),
        grid=(B_pad // TB,),
        in_specs=[
            pl.BlockSpec((1, TB), lambda i: (0, i)),   # x tile
            pl.BlockSpec((20, 1), resident),           # w1
            pl.BlockSpec((20, 1), resident),           # b1
            pl.BlockSpec((20, 20), resident),          # w2
            pl.BlockSpec((20, 1), resident),           # b2
            pl.BlockSpec((1, 20), resident),           # w3
            pl.BlockSpec((1, 1), resident),            # b3
        ],
        out_specs=pl.BlockSpec((1, TB), lambda i: (0, i)),
        compiler_params=pltpu.CompilerParams(
            dimension_semantics=("parallel",),          # batch tiles are independent
            vmem_limit_bytes=32 * 1024 * 1024,
        ),
    )(xt, params["w1"], params["b1"], params["w2"], params["b2"],
      params["w3"], params["b3"])

    return out_t[0, :B].reshape(B, 1)


def init_params(key):
    """Deterministic init matching torch Linear parameter shapes/ranges.

    torch Linear(in,out) stores weight as (out, in); we keep that layout since
    the kernel computes W @ x_T on the transposed (batch-on-lanes) problem.
    Biases kept 2D (out, 1) for TPU friendliness.
    """
    k1, k2, k3, k4, k5, k6 = jax.random.split(key, 6)

    def uinit(k, shape, fan_in):
        bound = 1.0 / jnp.sqrt(float(fan_in))
        return jax.random.uniform(k, shape, jnp.float32, -bound, bound)

    return {
        "w1": uinit(k1, (20, 1), 1),
        "b1": uinit(k2, (20, 1), 1),
        "w2": uinit(k3, (20, 20), 20),
        "b2": uinit(k4, (20, 1), 20),
        "w3": uinit(k5, (1, 20), 20),
        "b3": uinit(k6, (1, 1), 20),
    }


def mlp_ref(x, p):
    h = x @ p["w1"].T + p["b1"].T
    h = jnp.where(h > 0, h, NEG_SLOPE * h)
    h = h @ p["w2"].T + p["b2"].T
    h = jnp.where(h > 0, h, NEG_SLOPE * h)
    h = h @ p["w3"].T + p["b3"].T
    return jnp.maximum(h, 0.0)


if __name__ == "__main__":
    key = jax.random.PRNGKey(0)
    kx, kx2, kp = jax.random.split(key, 3)
    params = init_params(kp)

    # Small smoke test (single grid step, padded to one 128-lane tile).
    batch = 8
    x = jax.random.normal(kx, (batch, 1), dtype=jnp.float32)
    out = jax.block_until_ready(mlp_forward(x, params))
    ref = mlp_ref(x, params)
    assert out.shape == (batch, 1)
    assert jnp.allclose(out, ref, atol=1e-5, rtol=1e-5), "mismatch vs reference (B=8)"

    # Multi-tile test: exercises the batch grid, padding, and resident weights.
    batch2 = 300
    x2 = jax.random.normal(kx2, (batch2, 1), dtype=jnp.float32)
    out2 = jax.block_until_ready(mlp_forward(x2, params, tb=128))  # grid = (3,)
    ref2 = mlp_ref(x2, params)
    assert out2.shape == (batch2, 1)
    assert jnp.allclose(out2, ref2, atol=1e-5, rtol=1e-5), "mismatch vs reference (B=300)"

    print("KERNEL_OK")
</pallas_src>

<mosaic_0001>
module attributes {stable_mosaic.version = 11 : i64} {
  func.func @mlp_kernel(%arg0: i32, %arg1: memref<1x128xf32, #tpu.memory_space<vmem>>, %arg2: memref<20x1xf32, #tpu.memory_space<vmem>>, %arg3: memref<20x1xf32, #tpu.memory_space<vmem>>, %arg4: memref<20x20xf32, #tpu.memory_space<vmem>>, %arg5: memref<20x1xf32, #tpu.memory_space<vmem>>, %arg6: memref<1x20xf32, #tpu.memory_space<vmem>>, %arg7: memref<1x1xf32, #tpu.memory_space<vmem>>, %arg8: memref<1x128xf32, #tpu.memory_space<vmem>>) attributes {dimension_semantics = [#tpu.dimension_semantics<parallel>], iteration_bounds = array<i64: 1>, scalar_prefetch = 0 : i64, scratch_operands = 0 : i64, tpu.core_type = #tpu.core_type<tc>, window_params = [{transform_indices = @transform_0, window_bounds = array<i64: 1, 128>}, {pipeline_mode = #tpu.pipeline_mode<synchronous>, transform_indices = @transform_1, window_bounds = array<i64: 20, 1>}, {pipeline_mode = #tpu.pipeline_mode<synchronous>, transform_indices = @transform_2, window_bounds = array<i64: 20, 1>}, {pipeline_mode = #tpu.pipeline_mode<synchronous>, transform_indices = @transform_3, window_bounds = array<i64: 20, 20>}, {pipeline_mode = #tpu.pipeline_mode<synchronous>, transform_indices = @transform_4, window_bounds = array<i64: 20, 1>}, {pipeline_mode = #tpu.pipeline_mode<synchronous>, transform_indices = @transform_5, window_bounds = array<i64: 1, 20>}, {pipeline_mode = #tpu.pipeline_mode<synchronous>, transform_indices = @transform_6, window_bounds = array<i64: 1, 1>}, {transform_indices = @transform_7, window_bounds = array<i64: 1, 128>}]} {
    %c0 = arith.constant 0 : index
    %c0_0 = arith.constant 0 : index
    %0 = vector.load %arg1[%c0, %c0_0] : memref<1x128xf32, #tpu.memory_space<vmem>>, vector<1x128xf32>
    %c0_1 = arith.constant 0 : index
    %c0_2 = arith.constant 0 : index
    %1 = vector.load %arg2[%c0_1, %c0_2] : memref<20x1xf32, #tpu.memory_space<vmem>>, vector<20x1xf32>
    %2 = vector.broadcast %1 : vector<20x1xf32> to vector<20x128xf32>
    %3 = vector.broadcast %0 : vector<1x128xf32> to vector<20x128xf32>
    %4 = arith.mulf %2, %3 : vector<20x128xf32>
    %c0_3 = arith.constant 0 : index
    %c0_4 = arith.constant 0 : index
    %5 = vector.load %arg3[%c0_3, %c0_4] : memref<20x1xf32, #tpu.memory_space<vmem>>, vector<20x1xf32>
    %6 = vector.broadcast %5 : vector<20x1xf32> to vector<20x128xf32>
    %7 = arith.addf %4, %6 : vector<20x128xf32>
    %cst = arith.constant 0.000000e+00 : f32
    %8 = vector.broadcast %cst : f32 to vector<20x128xf32>
    %9 = arith.cmpf ogt, %7, %8 : vector<20x128xf32>
    %cst_5 = arith.constant 0.00999999977 : f32
    %10 = vector.broadcast %cst_5 : f32 to vector<20x128xf32>
    %11 = arith.mulf %10, %7 : vector<20x128xf32>
    %12 = arith.select %9, %7, %11 : vector<20x128xi1>, vector<20x128xf32>
    %c0_6 = arith.constant 0 : index
    %c0_7 = arith.constant 0 : index
    %13 = vector.load %arg4[%c0_6, %c0_7] : memref<20x20xf32, #tpu.memory_space<vmem>>, vector<20x20xf32>
    %cst_8 = arith.constant dense<0.000000e+00> : vector<20x128xf32>
    %14 = tpu.matmul %13, %12, %cst_8 {dimension_numbers = #tpu.dot_dimension_numbers<[1], [0], [0], [1], [0, 0, 1, 1], [], []>} : vector<20x20xf32>, vector<20x128xf32>, vector<20x128xf32> -> vector<20x128xf32>
    %c0_9 = arith.constant 0 : index
    %c0_10 = arith.constant 0 : index
    %15 = vector.load %arg5[%c0_9, %c0_10] : memref<20x1xf32, #tpu.memory_space<vmem>>, vector<20x1xf32>
    %16 = vector.broadcast %15 : vector<20x1xf32> to vector<20x128xf32>
    %17 = arith.addf %14, %16 : vector<20x128xf32>
    %cst_11 = arith.constant 0.000000e+00 : f32
    %18 = vector.broadcast %cst_11 : f32 to vector<20x128xf32>
    %19 = arith.cmpf ogt, %17, %18 : vector<20x128xf32>
    %cst_12 = arith.constant 0.00999999977 : f32
    %20 = vector.broadcast %cst_12 : f32 to vector<20x128xf32>
    %21 = arith.mulf %20, %17 : vector<20x128xf32>
    %22 = arith.select %19, %17, %21 : vector<20x128xi1>, vector<20x128xf32>
    %c0_13 = arith.constant 0 : index
    %c0_14 = arith.constant 0 : index
    %23 = vector.load %arg6[%c0_13, %c0_14] : memref<1x20xf32, #tpu.memory_space<vmem>>, vector<1x20xf32>
    %cst_15 = arith.constant dense<0.000000e+00> : vector<1x128xf32>
    %24 = tpu.matmul %23, %22, %cst_15 {dimension_numbers = #tpu.dot_dimension_numbers<[1], [0], [0], [1], [0, 0, 1, 1], [], []>} : vector<1x20xf32>, vector<20x128xf32>, vector<1x128xf32> -> vector<1x128xf32>
    %c0_16 = arith.constant 0 : index
    %c0_17 = arith.constant 0 : index
    %25 = vector.load %arg7[%c0_16, %c0_17] : memref<1x1xf32, #tpu.memory_space<vmem>>, vector<1x1xf32>
    %26 = vector.broadcast %25 : vector<1x1xf32> to vector<1x128xf32>
    %27 = arith.addf %24, %26 : vector<1x128xf32>
    %cst_18 = arith.constant 0.000000e+00 : f32
    %28 = vector.broadcast %cst_18 : f32 to vector<1x128xf32>
    %29 = arith.maximumf %27, %28 : vector<1x128xf32>
    %c0_19 = arith.constant 0 : index
    %c0_20 = arith.constant 0 : index
    %30 = vector.load %arg8[%c0_19, %c0_20] : memref<1x128xf32, #tpu.memory_space<vmem>>, vector<1x128xf32>
    tpu.vector_store %arg8[%c0_19, %c0_20], %29 {strides = array<i32>} : memref<1x128xf32, #tpu.memory_space<vmem>>, vector<1x128xf32>,
    return
  }
  func.func @transform_0(%arg0: i32) -> (i32, i32) {
    %c0_i32 = arith.constant 0 : i32
    %c0_i32_0 = arith.constant 0 : i32
    return %c0_i32, %arg0 : i32, i32
  }
  func.func @transform_1(%arg0: i32) -> (i32, i32) {
    %c0_i32 = arith.constant 0 : i32
    %c0_i32_0 = arith.constant 0 : i32
    %c0_i32_1 = arith.constant 0 : i32
    return %c0_i32, %c0_i32_0 : i32, i32
  }
  func.func @transform_2(%arg0: i32) -> (i32, i32) {
    %c0_i32 = arith.constant 0 : i32
    %c0_i32_0 = arith.constant 0 : i32
    %c0_i32_1 = arith.constant 0 : i32
    return %c0_i32, %c0_i32_0 : i32, i32
  }
  func.func @transform_3(%arg0: i32) -> (i32, i32) {
    %c0_i32 = arith.constant 0 : i32
    %c0_i32_0 = arith.constant 0 : i32
    %c0_i32_1 = arith.constant 0 : i32
    return %c0_i32, %c0_i32_0 : i32, i32
  }
  func.func @transform_4(%arg0: i32) -> (i32, i32) {
    %c0_i32 = arith.constant 0 : i32
    %c0_i32_0 = arith.constant 0 : i32
    %c0_i32_1 = arith.constant 0 : i32
    return %c0_i32, %c0_i32_0 : i32, i32
  }
  func.func @transform_5(%arg0: i32) -> (i32, i32) {
    %c0_i32 = arith.constant 0 : i32
    %c0_i32_0 = arith.constant 0 : i32
    %c0_i32_1 = arith.constant 0 : i32
    return %c0_i32, %c0_i32_0 : i32, i32
  }
  func.func @transform_6(%arg0: i32) -> (i32, i32) {
    %c0_i32 = arith.constant 0 : i32
    %c0_i32_0 = arith.constant 0 : i32
    %c0_i32_1 = arith.constant 0 : i32
    return %c0_i32, %c0_i32_0 : i32, i32
  }
  func.func @transform_7(%arg0: i32) -> (i32, i32) {
    %c0_i32 = arith.constant 0 : i32
    %c0_i32_0 = arith.constant 0 : i32
    return %c0_i32, %arg0 : i32, i32
  }
}

</mosaic_0001>

<bundles_post_ra>
// kernel: tpu_custom_call.1
= control target key start
LH: loop header
LB: loop body
LE: loop exit
PB: predicated region body
PF: predicated region fallthrough
CT: control target
= control target key end

     0   :  { %s504_s0 = inlined_call_operand.vmem [shape: f32[1,128], index: 0, kind: input, shape index: {}]   ;;  %s505_s1 = inlined_call_operand.vmem [shape: f32[20,1], index: 1, kind: input, shape index: {}]   ;;  %s506_s2 = inlined_call_operand.vmem [shape: f32[20,1], index: 2, kind: input, shape index: {}]   ;;  %s507_s3 = inlined_call_operand.vmem [shape: f32[20,20], index: 3, kind: input, shape index: {}]   ;;  %s508_s4 = inlined_call_operand.vmem [shape: f32[20,1], index: 4, kind: input, shape index: {}]   ;;  %s509_s5 = inlined_call_operand.vmem [shape: f32[1,20], index: 5, kind: input, shape index: {}]   ;;  %s510_s6 = inlined_call_operand.<no memory space> [shape: f32[1,1], index: 6, kind: input, shape index: {}]   ;;  %s511_s7 = inlined_call_operand.hbm [shape: f32[1,128], index: 7, kind: output, shape index: {}]  }
   0x1   :  { %v12_v0 = vstv %s510_s6 }
   0x2   :  { %13 = vst [vmem:[#allocation2] sm:$0x1] %v12_v0 }
   0x3   :  { %v57_v1 = vld [vmem:[%s506_s2] sm:$0xff]  ;;  %v392_v3 = vmov 0   ;;  %v58_v4 = vld [vmem:[%s506_s2 + $0x8] sm:$0xff] }
   0x4   :  { %v30_v2 = vld [vmem:[%s505_s1] sm:$0xff]  ;;  %367 = vset.pattern.permute.xlu1 %v392_v3  ;;  %366 = vset.pattern.permute.xlu0 %v392_v3  ;;  %v31_v5 = vld [vmem:[%s505_s1 + $0x8] sm:$0xff] }
   0x5   :  { %62 = vperm.xlu1 %367, %v57_v1   ;;  %35 = vperm.xlu0 %366, %v30_v2  }
   0x6   :  { %14 = vsyncpa [#allocation4], 0  ;;  %v59_v6 = vld [vmem:[%s506_s2 + $0x10] sm:$0xf]  ;;  %v91_v8 = vld [vmem:[%s508_s4 + $0x8] sm:$0xff]  ;;  %v393_v12 = vmov 0.0|0.0   ;;  %v218_v57 = vlaneseq }
   0x7   :  { %v32_v7 = vld [vmem:[%s505_s1 + $0x10] sm:$0xf]  ;;  %v90_v9 = vld [vmem:[%s508_s4] sm:$0xff]  ;;  %355 = vmatprep.subr.bf16.mxu0 %v393_v12  ;;  %358 = vmatprep.subr.bf16.mxu1 %v393_v12  ;;  %vm394_vm0 = vmmov 0   ;;  %v395_v13 = vmov 0.0   ;;  %vm118_vm4 = vcmask 1043456  }
   0x8   :  { %v92_v11 = vld [vmem:[%s508_s4 + $0x10] sm:$0xf]  ;;  %337 = vmatprep.mubr.msk.f32.mxu0 %vm394_vm0, %v395_v13  ;;  %352 = vmatprep.mubr.msk.f32.mxu1 %vm394_vm0, %v395_v13  ;;  %v314_v14 = vld [vmem:[%s504_s0] ss:$0 sm:$0xff]  ;;  %vm108_vm5 = vcmask 162816   ;;  %v88_v35 = vld [vmem:[%s507_s3 + $0x8] sm:$0xff] }
   0x9   :  { %67 = vperm.xlu1 %367, %v58_v4   ;;  %40 = vperm.xlu0 %366, %v31_v5   ;;  %v212_v10 = vld [vmem:[#allocation2] sm:$0x1]  ;;  %v89_v36 = vld [vmem:[%s507_s3 + $0x10] sm:$0xf]  ;;  %v219_v58 = vshrl.u32 %v218_v57, 7  ;;  %s396_s25 = smov [#allocation3]  }
   0xa   :  { %v87_v33 = vld [vmem:[%s507_s3] sm:$0xff]  ;;  %s306_s26 = sshll.u32 %s396_s25, 4  ;;  %s307_s26 = int_to_ptr.vmem [resolvable:$true] %s306_s26 }
   0xb   :  { %v211_v55 = vld [vmem:[%s509_s5] sm:$0x1]  ;;  %v220_v59 = vsub.s32 0, %v219_v58  ;;  %s368_s27 = scalar_lea.vmem %s307_s26, 16  ;;  %s372_s5 = scalar_lea.vmem %s307_s26, 32 }
   0xc   :  { %p369_p0 = scmp.ne.s32.totalorder %s307_s26, %s368_s27  ;;  %p373_p1 = scmp.lt.s32.totalorder %s307_s26, %s307_s26 }
   0xd   :  { %72 = vperm.xlu1 %367, %v59_v6   ;;  %45 = vperm.xlu0 %366, %v32_v7   ;;  %p374_p2 = scmp.lt.s32.totalorder %s372_s5, %s368_s27 }
   0xf   :  { %p375_p3 = por %p374_p2, %p373_p1 }
  0x11   :  { %100 = vperm.xlu1 %367, %v91_v8   ;;  %95 = vperm.xlu0 %366, %v90_v9   ;;  %p376_p4 = pnand %p375_p3, %p369_p0 }
  0x15   :  { %215 = vperm.xlu1 %367, %v212_v10   ;;  %105 = vperm.xlu0 %366, %v92_v11  }
  0x84   :  { %v63_v15 = vpop.permute.xlu1 %62  ;;  %v36_v16 = vpop.permute.xlu0 %35 }
  0x85   :  { %v54_v17 = vmul.f32 %v314_v14, %v36_v16 }
  0x87   :  { %v75_v18 = vadd.f32 %v63_v15, %v54_v17 }
  0x88   :  { %v68_v19 = vpop.permute.xlu1 %67  ;;  %v41_v20 = vpop.permute.xlu0 %40 }
  0x89   :  { %v55_v21 = vmul.f32 %v314_v14, %v41_v20  ;;  %v81_v23 = vmul.f32 0.01, %v75_v18  ;;  %vm78_vm1 = vcmp.gt.f32.partialorder %v75_v18, 0.0 }
  0x8b   :  { %v76_v22 = vadd.f32 %v68_v19, %v55_v21  ;;  %v84_v29 = vsel %vm78_vm1, %v75_v18, %v81_v23 }
  0x8c   :  { %v46_v24 = vpop.permute.xlu0 %45  ;;  %v73_v27 = vpop.permute.xlu1 %72 }
  0x8d   :  { %v56_v25 = vmul.f32 %v314_v14, %v46_v24  ;;  %vm79_vm2 = vcmp.gt.f32.partialorder %v76_v22, 0.0  ;;  %v82_v26 = vmul.f32 0.01, %v76_v22 }
  0x8f   :  { %v77_v28 = vadd.f32 %v73_v27, %v56_v25  ;;  %v85_v30 = vsel %vm79_vm2, %v76_v22, %v82_v26 }
  0x90   :  { %v356_v31 = vpack.c.bf16 %v85_v30, %v84_v29  ;;  %v96_v37 = vpop.permute.xlu0 %95  ;;  %v101_v41 = vpop.permute.xlu1 %100 }
  0x91   :  { %v83_v32 = vmul.f32 0.01, %v77_v28  ;;  %vm80_vm3 = vcmp.gt.f32.partialorder %v77_v28, 0.0 }
  0x92   :  { %357 = vmatpush3.bf16.msra.mxu0 %v356_v31 }
  0x93   :  { %335 = vmatprep.subr.mxu0 %v395_v13  ;;  %v86_v34 = vsel %vm80_vm3, %v77_v28, %v83_v32 }
  0x94   :  { %v106_v47 = vpop.permute.xlu0 %105  ;;  %v216_v60 = vpop.permute.xlu1 %215 }
  0x95   :  { %v221_v61 = vrot.slane %v216_v60, %v220_v59 }
  0x96   :  { %336 = vmatpush3.msk.msra.mxu0 %vm118_vm4, %v86_v34 }
  0x97   :  { %338 = vmatmul.mubr.msk.f32.vlgmr.msra.gmra.mrb[0].mxu0 %vm108_vm5, %v87_v33 }
  0x98   :  { %340 = vmatprep.mubr.msk.f32.mxu0 %vm394_vm0, %v395_v13 }
  0x9b   :  { %341 = vmatmul.mubr.msk.f32.gmra.mrb[2].mxu0 %vm108_vm5, %v88_v35 }
  0x9c   :  { %343 = vmatprep.mubr.msk.f32.mxu0 %vm394_vm0, %v395_v13 }
  0x9f   :  { %344 = vmatmul.mubr.msk.f32.gmra.mrb[4].mxu0 %vm108_vm5, %v89_v36 }
 0x16a   :  { %v188_v38 = vpop.f32.mrb[0].mxu0 }
 0x16b   :  { %v189_v39 = vadd.f32 %v188_v38, %v96_v37  ;;  %v339_v40 = vpop.f32.mrb[1].mxu0 }
 0x16d   :  { %v205_v43 = vmul.f32 0.01, %v189_v39  ;;  %vm202_vm6 = vcmp.gt.f32.partialorder %v189_v39, 0.0 }
 0x16e   :  { %v193_v42 = vpop.f32.mrb[2].mxu0 }
 0x16f   :  { %v194_v44 = vadd.f32 %v193_v42, %v101_v41  ;;  %v342_v45 = vpop.f32.mrb[3].mxu0  ;;  %v208_v51 = vsel %vm202_vm6, %v189_v39, %v205_v43 }
 0x171   :  { %v206_v46 = vmul.f32 0.01, %v194_v44  ;;  %vm203_vm7 = vcmp.gt.f32.partialorder %v194_v44, 0.0 }
 0x172   :  { %v198_v48 = vpop.f32.mrb[4].mxu0 }
 0x173   :  { %v199_v49 = vadd.f32 %v198_v48, %v106_v47  ;;  %v345_v50 = vpop.f32.mrb[5].mxu0  ;;  %v209_v52 = vsel %vm203_vm7, %v194_v44, %v206_v46 }
 0x174   :  { %v359_v53 = vpack.c.bf16 %v209_v52, %v208_v51 }
 0x175   :  { %v207_v54 = vmul.f32 0.01, %v199_v49  ;;  %vm204_vm8 = vcmp.gt.f32.partialorder %v199_v49, 0.0 }
 0x176   :  { %360 = vmatpush3.bf16.msra.mxu1 %v359_v53 }
 0x177   :  { %350 = vmatprep.subr.mxu1 %v395_v13  ;;  %v210_v56 = vsel %vm204_vm8, %v199_v49, %v207_v54 }
 0x17a   :  { %351 = vmatpush3.msk.msra.mxu1 %vm118_vm4, %v210_v56 }
 0x17b   :  { %353 = vmatmul.mubr.msk.f32.vlgmr.msra.gmra.mrb[0].mxu1 %vm108_vm5, %v211_v55 }
 0x24e   :  { %v294_v62 = vpop.f32.mrb[0].mxu1 }
 0x24f   :  { %v295_v63 = vadd.f32 %v294_v62, %v221_v61  ;;  %v354_v0 = vpop.f32.mrb[1].mxu1 }
 0x251   :  { %v298_v1 = vmax.f32 %v295_v63, 0.0 }
 0x253   :  { %299 = vst [vmem:[#allocation3] sm:$0x1] %v298_v1 }
 0x254   :  { %379 = shalt.err (!%p376_p4)
}
 0x255   :  { %s380_s30 = scalar_lea.hbm %s511_s7, 16 }
 0x256   :  { %p381_p5 = scmp.ne.s32.totalorder %s511_s7, %s380_s30  ;;  %p384_p6 = scmp.lt.u32.totalorder %s380_s30, %s511_s7 }
 0x258   :  { %p386_p7 = pnand %p384_p6, %p381_p5 }
 0x25a   :  { %389 = shalt.err (!%p386_p7)
}
 0x25b   :  { %309 = dma.vmem_to_hbm [thread:$0]  %s307_s26, 16, %s511_s7, [#allocation4]  }
 0x25c   :  { %390 = dma.done.wait [#allocation4], 16  }
 0x25d   :  { %391 = vsyncadd [#allocation4], 4294967280 }
 0x25e   :  { %313 = vsyncpa [#allocation4], 1 }

</bundles_post_ra>
